<compile_context>
chip_gen: v5e
topology: v5e:2x2
jax: 0.10.0
libtpu: 0.0.40
codegen_flags: <defaults>
</compile_context>

<pallas_src>
import functools

import jax
import jax.numpy as jnp
from jax import lax
from jax.experimental import pallas as pl
from jax.experimental.pallas import tpu as pltpu

N_EMBD = 32
BLOCK_SIZE = 8          # max sequence length (tril buffer size in the torch code)
DROPOUT = 0.1           # nn.Dropout is identity in eval mode


def _head_kernel(x_ref, w_ref, bias_ref, padb_ref, o_ref, *, head_dim):
    # One grid step == tb sequences (rows = tb*T sequence rows).
    x = x_ref[...]                                                     # (R, C) bf16
    w = w_ref[...]                                                     # (C, 3H) bf16

    # Fused QKV projection: one bf16 MXU matmul per step, f32 accumulate.
    # (C**-0.5 is already folded into the query columns of w.)
    qkv = jnp.dot(x, w, preferred_element_type=jnp.float32)           # (R, 3H) f32
    # NOTE: sub-vreg lane slices; may cost a one-time lane rotate each
    # (MXU/VPU have slack here — verified acceptable, see perf review item 6).
    q = qkv[:, :head_dim].astype(jnp.bfloat16)
    k = qkv[:, head_dim:2 * head_dim].astype(jnp.bfloat16)
    v = qkv[:, 2 * head_dim:].astype(jnp.bfloat16)

    # Scores for all tb sequences at once; contract last axes (no k.T in JAX).
    wei = lax.dot_general(q, k, (((1,), (1,)), ((), ())),
                          preferred_element_type=jnp.float32)         # (R, R) f32

    # Precomputed additive masks:
    #   bias_ref: block-diagonal (+ causal) mask, identical every step.
    #   padb_ref: per-step key pad mask, lane-dense (1, R).
    wei = wei + bias_ref[...] + padb_ref[0]

    # Numerically stable softmax over the (block-diagonally masked) key axis;
    # normalization happens after the PV matmul (broadcast over (R, H), not (R, R)).
    m = jnp.max(wei, axis=-1, keepdims=True)
    e = jnp.exp(wei - m)
    s = jnp.sum(e, axis=-1, keepdims=True)

    # TODO(synk): training-mode dropout on the attention weights is omitted
    # (nn.Dropout is identity in eval mode).
    o = jnp.dot(e.astype(jnp.bfloat16), v,
                preferred_element_type=jnp.float32)                   # (R, H) f32
    o = o * pl.reciprocal(s, approx=True)
    o_ref[...] = o.astype(o_ref.dtype)


def head_forward(x, w_key, w_query, w_value, pad_mask=None, mask=False):
    """Pallas equivalent of Head.forward (encoder_out=None path, eval mode)."""
    # TODO(synk): encoder_out cross-attention path is not implemented.
    B, T, C = x.shape
    H = w_key.shape[1]
    assert C == N_EMBD and T <= BLOCK_SIZE

    out_dtype = x.dtype

    if pad_mask is None:
        pad_mask = jnp.ones((B, T), dtype=jnp.int32)
    pad_mask = pad_mask.astype(jnp.int32)

    # Batch tile: tb is a multiple of 8 (keeps every block sublane-aligned)
    # targeting rows = tb*T ~= 128 so the score matrix stays lane-dense.
    tb = max(8, (128 // T) // 8 * 8)
    steps = -(-B // tb)

    # v7x has 2 TensorCores and this grid axis is the only cross-core sharding:
    # if everything fits in one step but there is a full step of real work,
    # split it so both cores get half.
    try:
        n_cores = int(getattr(jax.devices()[0], "num_cores", 1))
    except Exception:  # pragma: no cover - defensive
        n_cores = 1
    if n_cores >= 2 and steps == 1 and B * T >= 128 and tb >= 16 and tb % 16 == 0:
        tb //= 2
        steps = -(-B // tb)

    b_pad = steps * tb
    rows = tb * T

    if b_pad != B:
        x = jnp.concatenate([x, jnp.zeros((b_pad - B, T, C), x.dtype)], axis=0)
        pad_mask = jnp.concatenate(
            [pad_mask, jnp.zeros((b_pad - B, T), jnp.int32)], axis=0)

    # bf16 MXU operands (halves the x DMA too); accumulation stays f32 in-kernel.
    x2d = x.reshape(b_pad * T, C).astype(jnp.bfloat16)

    # Step-invariant additive mask: block-diagonal (sequences are independent)
    # plus optional causal mask inside each diagonal block. Constant index_map
    # => DMA'd into VMEM once and kept resident.
    r = jnp.arange(rows)
    allowed = (r[:, None] // T) == (r[None, :] // T)
    if mask:
        allowed = allowed & ((r[None, :] % T) <= (r[:, None] % T))
    bias = jnp.where(allowed, 0.0, -1e30).astype(jnp.float32)          # (R, R)

    # Lane-dense per-step key pad bias: (steps, 1, rows).
    pad_bias = jnp.where(pad_mask.reshape(steps, 1, rows) != 0,
                         0.0, -1e30).astype(jnp.float32)

    # Fused QKV weight: (C, 3H), order [query | key | value], with the
    # C**-0.5 score scale folded into the query columns.
    scale = float(C) ** (-0.5)
    w_qkv = jnp.concatenate(
        [w_query * scale, w_key, w_value], axis=1).astype(jnp.bfloat16)

    kernel = functools.partial(_head_kernel, head_dim=H)

    out2d = pl.pallas_call(
        kernel,
        out_shape=jax.ShapeDtypeStruct((b_pad * T, H), out_dtype),
        grid_spec=pltpu.PrefetchScalarGridSpec(
            num_scalar_prefetch=0,
            grid=(steps,),
            in_specs=[
                pl.BlockSpec((rows, C), lambda i: (i, 0)),        # x rows
                pl.BlockSpec((C, 3 * H), lambda i: (0, 0)),       # fused W (resident)
                pl.BlockSpec((rows, rows), lambda i: (0, 0)),     # static mask (resident)
                pl.BlockSpec((1, 1, rows), lambda i: (i, 0, 0)),  # pad bias (lane-dense)
            ],
            out_specs=pl.BlockSpec((rows, H), lambda i: (i, 0)),
        ),
        compiler_params=pltpu.CompilerParams(
            dimension_semantics=("parallel",)),
    )(x2d, w_qkv, bias, pad_bias)

    return out2d.reshape(b_pad, T, H)[:B]


def head_forward_ref(x, w_key, w_query, w_value, pad_mask=None, mask=False):
    """Plain-JAX reference mirroring the torch forward (eval mode)."""
    B, T, C = x.shape
    k = x @ w_key
    q = x @ w_query
    v = x @ w_value
    wei = (q @ jnp.swapaxes(k, -2, -1)) * (float(C) ** -0.5)
    neg_inf = jnp.float32(-1e30)
    if mask:
        tril = jnp.tril(jnp.ones((T, T), dtype=bool))
        wei = jnp.where(tril, wei, neg_inf)
    if pad_mask is not None:
        wei = jnp.where(pad_mask[:, None, :] != 0, wei, neg_inf)
    wei = jax.nn.softmax(wei, axis=-1)
    return wei @ v


if __name__ == "__main__":
    B, T, C, H = 2, 8, N_EMBD, 16

    key = jax.random.PRNGKey(0)
    kx, kk, kq, kv = jax.random.split(key, 4)

    x = jax.random.normal(kx, (B, T, C), dtype=jnp.float32)
    # Deterministic "Linear(N_EMBD, head_dim, bias=False)" weights, stored transposed.
    bound = 1.0 / (C ** 0.5)
    w_key = jax.random.uniform(kk, (C, H), jnp.float32, -bound, bound)
    w_query = jax.random.uniform(kq, (C, H), jnp.float32, -bound, bound)
    w_value = jax.random.uniform(kv, (C, H), jnp.float32, -bound, bound)

    # Second batch element has its last two key positions padded out.
    pad_mask = jnp.array(
        [[1, 1, 1, 1, 1, 1, 1, 1],
         [1, 1, 1, 1, 1, 1, 0, 0]], dtype=jnp.int32)

    out = head_forward(x, w_key, w_query, w_value, pad_mask=pad_mask, mask=True)
    out = jax.block_until_ready(out)

    ref = head_forward_ref(x, w_key, w_query, w_value, pad_mask=pad_mask, mask=True)
    assert out.shape == (B, T, H)
    # Tolerance relaxed for bf16 MXU operands + pl.reciprocal(approx=True) in
    # the softmax (reference is full f32).
    assert jnp.allclose(out, ref, atol=1e-2, rtol=1e-2), "mismatch vs reference"

    print("KERNEL_OK")
</pallas_src>

<mosaic_0001>
module attributes {stable_mosaic.version = 11 : i64} {
  func.func @_head_kernel(%arg0: i32, %arg1: memref<128x32xbf16, #tpu.memory_space<vmem>>, %arg2: memref<32x48xbf16, #tpu.memory_space<vmem>>, %arg3: memref<128x128xf32, #tpu.memory_space<vmem>>, %arg4: memref<1x1x128xf32, #tpu.memory_space<vmem>>, %arg5: memref<128x16xf32, #tpu.memory_space<vmem>>) attributes {dimension_semantics = [#tpu.dimension_semantics<parallel>], iteration_bounds = array<i64: 1>, scalar_prefetch = 0 : i64, scratch_operands = 0 : i64, tpu.core_type = #tpu.core_type<tc>, window_params = [{transform_indices = @transform_0, window_bounds = array<i64: 128, 32>}, {pipeline_mode = #tpu.pipeline_mode<synchronous>, transform_indices = @transform_1, window_bounds = array<i64: 32, 48>}, {pipeline_mode = #tpu.pipeline_mode<synchronous>, transform_indices = @transform_2, window_bounds = array<i64: 128, 128>}, {transform_indices = @transform_3, window_bounds = array<i64: 1, 1, 128>}, {transform_indices = @transform_4, window_bounds = array<i64: 128, 16>}]} {
    %c0 = arith.constant 0 : index
    %c0_0 = arith.constant 0 : index
    %0 = vector.load %arg1[%c0, %c0_0] : memref<128x32xbf16, #tpu.memory_space<vmem>>, vector<128x32xbf16>
    %c0_1 = arith.constant 0 : index
    %c0_2 = arith.constant 0 : index
    %1 = vector.load %arg2[%c0_1, %c0_2] : memref<32x48xbf16, #tpu.memory_space<vmem>>, vector<32x48xbf16>
    %cst = arith.constant dense<0.000000e+00> : vector<128x48xf32>
    %2 = tpu.matmul %0, %1, %cst {dimension_numbers = #tpu.dot_dimension_numbers<[1], [0], [0], [1], [0, 0, 1, 1], [], []>} : vector<128x32xbf16>, vector<32x48xbf16>, vector<128x48xf32> -> vector<128x48xf32>
    %3 = vector.extract_strided_slice %2 {offsets = [0, 0], sizes = [128, 16], strides = [1, 1]} : vector<128x48xf32> to vector<128x16xf32>
    %4 = arith.truncf %3 : vector<128x16xf32> to vector<128x16xbf16>
    %5 = vector.extract_strided_slice %2 {offsets = [0, 16], sizes = [128, 16], strides = [1, 1]} : vector<128x48xf32> to vector<128x16xf32>
    %6 = arith.truncf %5 : vector<128x16xf32> to vector<128x16xbf16>
    %7 = vector.extract_strided_slice %2 {offsets = [0, 32], sizes = [128, 16], strides = [1, 1]} : vector<128x48xf32> to vector<128x16xf32>
    %8 = arith.truncf %7 : vector<128x16xf32> to vector<128x16xbf16>
    %cst_3 = arith.constant dense<0.000000e+00> : vector<128x128xf32>
    %9 = tpu.matmul %4, %6, %cst_3 {dimension_numbers = #tpu.dot_dimension_numbers<[1], [1], [0], [0], [0, 0, 1, 0], [], []>} : vector<128x16xbf16>, vector<128x16xbf16>, vector<128x128xf32> -> vector<128x128xf32>
    %c0_4 = arith.constant 0 : index
    %c0_5 = arith.constant 0 : index
    %10 = vector.load %arg3[%c0_4, %c0_5] : memref<128x128xf32, #tpu.memory_space<vmem>>, vector<128x128xf32>
    %11 = arith.addf %9, %10 : vector<128x128xf32>
    %c0_6 = arith.constant 0 : index
    %c0_7 = arith.constant 0 : index
    %c0_8 = arith.constant 0 : index
    %12 = vector.load %arg4[%c0_6, %c0_7, %c0_8] : memref<1x1x128xf32, #tpu.memory_space<vmem>>, vector<1x1x128xf32>
    %13 = vector.shape_cast %12 : vector<1x1x128xf32> to vector<1x128xf32>
    %14 = vector.broadcast %13 : vector<1x128xf32> to vector<128x128xf32>
    %15 = arith.addf %11, %14 : vector<128x128xf32>
    %cst_9 = arith.constant dense<0xFF800000> : vector<128xf32>
    %16 = vector.multi_reduction <maximumf>, %15, %cst_9 [1] : vector<128x128xf32> to vector<128xf32>
    %17 = vector.shape_cast %16 : vector<128xf32> to vector<128x1xf32>
    %18 = vector.broadcast %17 : vector<128x1xf32> to vector<128x128xf32>
    %19 = arith.subf %15, %18 : vector<128x128xf32>
    %20 = math.exp %19 : vector<128x128xf32>
    %cst_10 = arith.constant dense<0.000000e+00> : vector<128xf32>
    %21 = vector.multi_reduction <add>, %20, %cst_10 [1] : vector<128x128xf32> to vector<128xf32>
    %22 = vector.shape_cast %21 : vector<128xf32> to vector<128x1xf32>
    %23 = arith.truncf %20 : vector<128x128xf32> to vector<128x128xbf16>
    %cst_11 = arith.constant dense<0.000000e+00> : vector<128x16xf32>
    %24 = tpu.matmul %23, %8, %cst_11 {dimension_numbers = #tpu.dot_dimension_numbers<[1], [0], [0], [1], [0, 0, 1, 1], [], []>} : vector<128x128xbf16>, vector<128x16xbf16>, vector<128x16xf32> -> vector<128x16xf32>
    %25 = tpu.reciprocal %22 {approx = true} : vector<128x1xf32> -> vector<128x1xf32>
    %26 = vector.broadcast %25 : vector<128x1xf32> to vector<128x16xf32>
    %27 = arith.mulf %24, %26 : vector<128x16xf32>
    %c0_12 = arith.constant 0 : index
    %c0_13 = arith.constant 0 : index
    %28 = vector.load %arg5[%c0_12, %c0_13] : memref<128x16xf32, #tpu.memory_space<vmem>>, vector<128x16xf32>
    tpu.vector_store %arg5[%c0_12, %c0_13], %27 {strides = array<i32>} : memref<128x16xf32, #tpu.memory_space<vmem>>, vector<128x16xf32>,
    return
  }
  func.func @transform_0(%arg0: i32) -> (i32, i32) {
    %c0_i32 = arith.constant 0 : i32
    %c0_i32_0 = arith.constant 0 : i32
    return %arg0, %c0_i32 : i32, i32
  }
  func.func @transform_1(%arg0: i32) -> (i32, i32) {
    %c0_i32 = arith.constant 0 : i32
    %c0_i32_0 = arith.constant 0 : i32
    %c0_i32_1 = arith.constant 0 : i32
    return %c0_i32, %c0_i32_0 : i32, i32
  }
  func.func @transform_2(%arg0: i32) -> (i32, i32) {
    %c0_i32 = arith.constant 0 : i32
    %c0_i32_0 = arith.constant 0 : i32
    %c0_i32_1 = arith.constant 0 : i32
    return %c0_i32, %c0_i32_0 : i32, i32
  }
  func.func @transform_3(%arg0: i32) -> (i32, i32, i32) {
    %c0_i32 = arith.constant 0 : i32
    %c0_i32_0 = arith.constant 0 : i32
    %c0_i32_1 = arith.constant 0 : i32
    return %arg0, %c0_i32, %c0_i32_0 : i32, i32, i32
  }
  func.func @transform_4(%arg0: i32) -> (i32, i32) {
    %c0_i32 = arith.constant 0 : i32
    %c0_i32_0 = arith.constant 0 : i32
    return %arg0, %c0_i32 : i32, i32
  }
}

</mosaic_0001>

<bundles_post_ra>
// kernel: tpu_custom_call.1
= control target key start
LH: loop header
LB: loop body
LE: loop exit
PB: predicated region body
PF: predicated region fallthrough
CT: control target
= control target key end

     0   :  { %9 = vsyncpa [#allocation3], 0  ;;  %s770_s18 = smov [#allocation2]   ;;  %s771_s20 = smov 128   ;;  %s1053_s0 = inlined_call_operand.vmem [shape: bf16[128,32], index: 0, kind: input, shape index: {}]   ;;  %s1054_s1 = inlined_call_operand.vmem [shape: bf16[32,48], index: 1, kind: input, shape index: {}]   ;;  %s1055_s2 = inlined_call_operand.hbm [shape: f32[128,128], index: 2, kind: input, shape index: {}]   ;;  %s1056_s3 = inlined_call_operand.vmem [shape: f32[1,1,128], index: 3, kind: input, shape index: {}]   ;;  %s1057_s4 = inlined_call_operand.vmem [shape: f32[128,16], index: 4, kind: output, shape index: {}]  }
   0x1   :  { %s18_s17 = sshll.u32 %s1055_s2, 4  ;;  %s20_s19 = sshll.u32 %s770_s18, 4  ;;  %s19_s17 = int_to_ptr.hbm [resolvable:$true] %s18_s17  ;;  %s21_s19 = int_to_ptr.vmem [resolvable:$true] %s20_s19 }
   0x2   :  { %s772_s21 = smov 8  }
   0x3   :  { %26 = dma.hbm_to_vmem [thread:$0]  %s19_s17, 2048, %s21_s19, [#allocation3], %s771_s20, %s771_s20, %s772_s21  }
   0x4   :  { %768 = dma.done.wait [#allocation3], 2048  }
   0x5   :  { %769 = vsyncadd [#allocation3], 4294965248  ;;  %v657_v0 = vld [vmem:[%s1054_s1 + $0x8] sm:$0xff]  ;;  %v656_v1 = vld [vmem:[%s1054_s1] sm:$0xff]  ;;  %vm106_vm0 = vcmask 261120   ;;  %s773_s14 = smov 112  }
   0x6   :  { %137 = vmatpush.bf16.msra.mxu0 %v657_v0  ;;  %v648_v2 = vld [vmem:[%s1053_s0] sm:$0xff]  ;;  %v649_v3 = vld [vmem:[%s1053_s0 + $0x8] sm:$0xff]  ;;  %v650_v4 = vld [vmem:[%s1053_s0 + $0x10] sm:$0xff]  ;;  %vm228_vm1 = vcmask 130048  }
   0x7   :  { %v651_v5 = vld [vmem:[%s1053_s0 + $0x18] sm:$0xff]  ;;  %v652_v6 = vld [vmem:[%s1053_s0 + $0x20] sm:$0xff]  ;;  %v653_v7 = vld [vmem:[%s1053_s0 + $0x28] sm:$0xff] }
   0x8   :  { %v654_v8 = vld [vmem:[%s1053_s0 + $0x30] sm:$0xff]  ;;  %v655_v9 = vld [vmem:[%s1053_s0 + $0x38] sm:$0xff]  ;;  %s774_s0 = smov 96   ;;  %v188_v58 = vld [vmem:[#allocation2] sm:$0xff] }
   0x9   :  { %v892_v59 = vld [vmem:[%s1056_s3] ss:$0 sm:$0xff]  ;;  %v189_v0 = vld [vmem:[#allocation2 + $0x8] sm:$0xff] }
   0xa   :  { %138 = vmatpush.bf16.msra.mxu0 %v656_v1 }
   0xd   :  { %632 = vmatmul.msk.bf16.vlgmr.msra.gmra.mxu0 %vm106_vm0, %v648_v2 }
  0x1d   :  { %633 = vmatmul.msk.bf16.gmra.mxu0 %vm106_vm0, %v649_v3 }
  0x2d   :  { %634 = vmatmul.msk.bf16.gmra.mxu0 %vm106_vm0, %v650_v4 }
  0x3d   :  { %635 = vmatmul.msk.bf16.gmra.mxu0 %vm106_vm0, %v651_v5  ;;  %v190_v5 = vld [vmem:[#allocation2 + $0x10] sm:$0xff] }
  0x4d   :  { %636 = vmatmul.msk.bf16.gmra.mxu0 %vm106_vm0, %v652_v6 }
  0x5d   :  { %637 = vmatmul.msk.bf16.gmra.mxu0 %vm106_vm0, %v653_v7 }
  0x6d   :  { %638 = vmatmul.msk.bf16.gmra.mxu0 %vm106_vm0, %v654_v8 }
  0x7d   :  { %639 = vmatmul.msk.bf16.gmra.mxu0 %vm106_vm0, %v655_v9  ;;  %v200_v9 = vld [vmem:[#allocation2 + $0x60] sm:$0xff] }
  0x8a   :  { %v140_v10 = vpop.f32.mrf.mxu0 }
  0x92   :  { %v142_v11 = vpop.f32.mrf.mxu0 }
  0x93   :  { %v833_v12 = vpack.c.bf16 %v142_v11, %v140_v10  ;;  %v191_v11 = vld [vmem:[#allocation2 + $0x18] sm:$0xff] }
  0x9a   :  { %v145_v13 = vpop.f32.mrf.mxu0 }
  0xa2   :  { %v147_v14 = vpop.f32.mrf.mxu0 }
  0xa3   :  { %v835_v15 = vpack.c.bf16 %v147_v14, %v145_v13 }
  0xaa   :  { %v150_v16 = vpop.f32.mrf.mxu0 }
  0xb2   :  { %v152_v17 = vpop.f32.mrf.mxu0 }
  0xb3   :  { %v840_v22 = vpack.c.bf16 %v152_v17, %v150_v16 }
  0xba   :  { %v155_v18 = vpop.f32.mrf.mxu0 }
  0xc2   :  { %v157_v19 = vpop.f32.mrf.mxu0 }
  0xc3   :  { %v837_v20 = vpack.c.bf16 %v157_v19, %v155_v18  ;;  %v192_v18 = vld [vmem:[#allocation2 + $0x20] sm:$0xff] }
  0xc5   :  { %218 = vrot.lane.b32.xlu2 %v837_v20, %s773_s14 }
  0xca   :  { %v160_v21 = vpop.f32.mrf.mxu0 }
  0xcd   :  { %216 = vrot.lane.b32.xlu2 %v840_v22, %s773_s14 }
  0xd2   :  { %v162_v23 = vpop.f32.mrf.mxu0 }
  0xd3   :  { %v843_v24 = vpack.c.bf16 %v162_v23, %v160_v21  ;;  %v193_v23 = vld [vmem:[#allocation2 + $0x28] sm:$0xff] }
  0xd5   :  { %474 = vrot.lane.b32.xlu2 %v843_v24, %s774_s0 }
  0xda   :  { %v165_v25 = vpop.f32.mrf.mxu0 }
  0xe2   :  { %v167_v26 = vpop.f32.mrf.mxu0 }
  0xe3   :  { %v846_v27 = vpack.c.bf16 %v167_v26, %v165_v25 }
  0xe5   :  { %222 = vrot.lane.b32.xlu1 %v846_v27, %s773_s14 }
  0xea   :  { %v170_v28 = vpop.f32.mrf.mxu0 }
  0xed   :  { %220 = vrot.lane.b32.xlu1 %v843_v24, %s773_s14 }
  0xf2   :  { %v172_v29 = vpop.f32.mrf.mxu0 }
  0xf3   :  { %v856_v33 = vpack.c.bf16 %v172_v29, %v170_v28  ;;  %v194_v29 = vld [vmem:[#allocation2 + $0x30] sm:$0xff] }
  0xf5   :  { %212 = vrot.lane.b32.xlu1 %v833_v12, %s773_s14 }
  0xfa   :  { %v175_v30 = vpop.f32.mrf.mxu0 }
  0xfd   :  { %476 = vrot.lane.b32.xlu1 %v846_v27, %s774_s0 }
 0x102   :  { %v177_v31 = vpop.f32.mrf.mxu0 }
 0x103   :  { %v852_v32 = vpack.c.bf16 %v177_v31, %v175_v30 }
 0x105   :  { %480 = vrot.lane.b32.xlu2 %v852_v32, %s774_s0  ;;  %226 = vrot.lane.b32.xlu0 %v852_v32, %s773_s14 }
 0x10d   :  { %224 = vrot.lane.b32.xlu0 %v856_v33, %s773_s14 }
 0x115   :  { %214 = vrot.lane.b32.xlu0 %v835_v15, %s773_s14 }
 0x11d   :  { %478 = vrot.lane.b32.xlu0 %v856_v33, %s774_s0 }
 0x11f   :  { %v219_v34 = vpop.permute.xlu2 %218 }
 0x120   :  { %v263_v51 = vsel %vm228_vm1, %v219_v34, 0 }
 0x125   :  { %472 = vrot.lane.b32.xlu0 %v837_v20, %s774_s0 }
 0x127   :  { %v217_v35 = vpop.permute.xlu2 %216 }
 0x128   :  { %v260_v53 = vsel %vm228_vm1, %v217_v35, 0  ;;  %v195_v35 = vld [vmem:[#allocation2 + $0x38] sm:$0xff] }
 0x12d   :  { %470 = vrot.lane.b32.xlu0 %v840_v22, %s774_s0 }
 0x12f   :  { %v475_v36 = vpop.permute.xlu2 %474 }
 0x135   :  { %468 = vrot.lane.b32.xlu0 %v835_v15, %s774_s0 }
 0x13d   :  { %466 = vrot.lane.b32.xlu0 %v833_v12, %s774_s0 }
 0x157   :  { %v223_v38 = vpop.permute.xlu1 %222 }
 0x158   :  { %v269_v45 = vsel %vm228_vm1, %v223_v38, 0 }
 0x15f   :  { %v481_v37 = vpop.permute.xlu2 %480  ;;  %v221_v41 = vpop.permute.xlu1 %220 }
 0x160   :  { %490 = vmatpush.bf16.msra.mxu2 %v481_v37  ;;  %v266_v48 = vsel %vm228_vm1, %v221_v41, 0 }
 0x167   :  { %v213_v46 = vpop.permute.xlu1 %212 }
 0x168   :  { %v254_v57 = vsel %vm228_vm1, %v213_v46, 0 }
 0x16f   :  { %v477_v49 = vpop.permute.xlu1 %476 }
 0x177   :  { %v227_v39 = vpop.permute.xlu0 %226 }
 0x178   :  { %v275_v40 = vsel %vm228_vm1, %v227_v39, 0  ;;  %v196_v39 = vld [vmem:[#allocation2 + $0x40] sm:$0xff] }
 0x179   :  { %277 = vmatpush.bf16.xpose.msra.mxu1 %v275_v40  ;;  %658 = vmatpush.bf16.xpose.msra.mxu3 %v275_v40 }
 0x17f   :  { %v225_v42 = vpop.permute.xlu0 %224 }
 0x180   :  { %v272_v43 = vsel %vm228_vm1, %v225_v42, 0 }
 0x181   :  { %278 = vmatpush.bf16.xpose.msra.mxu1 %v272_v43  ;;  %659 = vmatpush.bf16.xpose.msra.mxu3 %v272_v43  ;;  %v198_v43 = vld [vmem:[#allocation2 + $0x50] sm:$0xff] }
 0x187   :  { %v215_v44 = vpop.permute.xlu0 %214 }
 0x188   :  { %v257_v55 = vsel %vm228_vm1, %v215_v44, 0  ;;  %v197_v44 = vld [vmem:[#allocation2 + $0x48] sm:$0xff] }
 0x189   :  { %279 = vmatpush.bf16.xpose.msra.mxu1 %v269_v45  ;;  %660 = vmatpush.bf16.xpose.msra.mxu3 %v269_v45 }
 0x18f   :  { %v479_v47 = vpop.permute.xlu0 %478 }
 0x190   :  { %491 = vmatpush.bf16.msra.mxu2 %v479_v47 }
 0x191   :  { %280 = vmatpush.bf16.xpose.msra.mxu1 %v266_v48  ;;  %661 = vmatpush.bf16.xpose.msra.mxu3 %v266_v48 }
 0x194   :  { %492 = vmatpush.bf16.msra.mxu2 %v477_v49 }
 0x197   :  { %v473_v50 = vpop.permute.xlu0 %472 }
 0x198   :  { %493 = vmatpush.bf16.msra.mxu2 %v475_v36 }
 0x199   :  { %281 = vmatpush.bf16.xpose.msra.mxu1 %v263_v51  ;;  %662 = vmatpush.bf16.xpose.msra.mxu3 %v263_v51  ;;  %v201_v51 = vld [vmem:[#allocation2 + $0x68] sm:$0xff] }
 0x19c   :  { %494 = vmatpush.bf16.msra.mxu2 %v473_v50 }
 0x19f   :  { %v471_v52 = vpop.permute.xlu0 %470 }
 0x1a0   :  { %495 = vmatpush.bf16.msra.mxu2 %v471_v52 }
 0x1a1   :  { %282 = vmatpush.bf16.xpose.msra.mxu1 %v260_v53  ;;  %663 = vmatpush.bf16.xpose.msra.mxu3 %v260_v53 }
 0x1a7   :  { %v469_v54 = vpop.permute.xlu0 %468 }
 0x1a8   :  { %496 = vmatpush.bf16.msra.mxu2 %v469_v54 }
 0x1a9   :  { %283 = vmatpush.bf16.xpose.msra.mxu1 %v257_v55  ;;  %664 = vmatpush.bf16.xpose.msra.mxu3 %v257_v55 }
 0x1af   :  { %v467_v56 = vpop.permute.xlu0 %466 }
 0x1b0   :  { %497 = vmatpush.bf16.msra.mxu2 %v467_v56 }
 0x1b1   :  { %284 = vmatpush.bf16.xpose.msra.mxu1 %v254_v57  ;;  %665 = vmatpush.bf16.xpose.msra.mxu3 %v254_v57 }
 0x1b8   :  { %640 = vmatmul.msk.bf16.vlgmr.msra.gmra.mxu1 %vm228_vm1, %v833_v12  ;;  %645 = vmatmul.msk.bf16.vlgmr.msra.gmra.mxu3 %vm228_vm1, %v846_v27  ;;  %v203_v27 = vld [vmem:[#allocation2 + $0x78] sm:$0xff] }
 0x1b9   :  { %666 = vmatpush.bf16.msrb.mxu3 %v481_v37 }
 0x1bd   :  { %667 = vmatpush.bf16.msrb.mxu3 %v479_v47 }
 0x1c1   :  { %668 = vmatpush.bf16.msrb.mxu3 %v477_v49 }
 0x1c5   :  { %669 = vmatpush.bf16.msrb.mxu3 %v475_v36 }
 0x1c8   :  { %641 = vmatmul.msk.bf16.gmra.mxu1 %vm228_vm1, %v835_v15  ;;  %646 = vmatmul.msk.bf16.gmra.mxu3 %vm228_vm1, %v856_v33 }
 0x1c9   :  { %670 = vmatpush.bf16.msrb.mxu3 %v473_v50  ;;  %v199_v50 = vld [vmem:[#allocation2 + $0x58] sm:$0xff] }
 0x1cd   :  { %671 = vmatpush.bf16.msrb.mxu3 %v471_v52 }
 0x1d1   :  { %672 = vmatpush.bf16.msrb.mxu3 %v469_v54 }
 0x1d5   :  { %673 = vmatpush.bf16.msrb.mxu3 %v467_v56  ;;  %v202_v56 = vld [vmem:[#allocation2 + $0x70] sm:$0xff] }
 0x1d8   :  { %642 = vmatmul.msk.bf16.gmra.mxu1 %vm228_vm1, %v840_v22  ;;  %647 = vmatmul.msk.bf16.gmra.mxu3 %vm228_vm1, %v852_v32 }
 0x1e8   :  { %643 = vmatmul.msk.bf16.gmra.mxu1 %vm228_vm1, %v837_v20 }
 0x1f8   :  { %644 = vmatmul.msk.bf16.gmra.mxu1 %vm228_vm1, %v843_v24 }
 0x235   :  { %v286_v60 = vpop.f32.mrf.mxu1 }
 0x236   :  { %v287_v61 = vadd.f32 %v286_v60, %v188_v58 }
 0x238   :  { %v895_v62 = vadd.f32 %v892_v59, %v287_v61 }
 0x23a   :  { %346 = vmax.xlane.f32.xlu1 %v895_v62 }
 0x23b   :  { %v311_v63 = vpop.f32.mrf.mxu3 }
 0x23c   :  { %v312_v45 = vadd.f32 %v311_v63, %v198_v43 }
 0x23d   :  { %v288_v1 = vpop.f32.mrf.mxu1 }
 0x23e   :  { %v289_v2 = vadd.f32 %v288_v1, %v189_v0  ;;  %v942_v49 = vadd.f32 %v892_v59, %v312_v45 }
 0x240   :  { %v899_v3 = vadd.f32 %v892_v59, %v289_v2 }
 0x242   :  { %348 = vmax.xlane.f32.xlu2 %v899_v3 }
 0x243   :  { %v313_v4 = vpop.f32.mrf.mxu3 }
 0x244   :  { %v314_v52 = vadd.f32 %v313_v4, %v199_v50 }
 0x245   :  { %v291_v6 = vpop.f32.mrf.mxu1 }
 0x246   :  { %v292_v7 = vadd.f32 %v291_v6, %v190_v5  ;;  %v947_v54 = vadd.f32 %v892_v59, %v314_v52 }
 0x248   :  { %v903_v8 = vadd.f32 %v892_v59, %v292_v7 }
 0x24a   :  { %350 = vmax.xlane.f32.xlu0 %v903_v8 }
 0x24b   :  { %v316_v10 = vpop.f32.mrf.mxu3 }
 0x24c   :  { %v317_v12 = vadd.f32 %v316_v10, %v200_v9 }
 0x24d   :  { %v293_v13 = vpop.f32.mrf.mxu1 }
 0x24e   :  { %v294_v14 = vadd.f32 %v293_v13, %v191_v11  ;;  %v907_v15 = vadd.f32 %v892_v59, %v317_v12 }
 0x250   :  { %v910_v16 = vadd.f32 %v892_v59, %v294_v14 }
 0x252   :  { %370 = vmax.xlane.f32.xlu0 %v907_v15  ;;  %352 = vmax.xlane.f32.xlu2 %v910_v16 }
 0x253   :  { %v318_v17 = vpop.f32.mrf.mxu3 }
 0x254   :  { %v319_v53 = vadd.f32 %v318_v17, %v201_v51 }
 0x255   :  { %v296_v19 = vpop.f32.mrf.mxu1 }
 0x256   :  { %v297_v20 = vadd.f32 %v296_v19, %v192_v18  ;;  %v950_v55 = vadd.f32 %v892_v59, %v319_v53 }
 0x258   :  { %v915_v21 = vadd.f32 %v892_v59, %v297_v20 }
 0x25a   :  { %354 = vmax.xlane.f32.xlu1 %v915_v21 }
 0x25b   :  { %v321_v22 = vpop.f32.mrf.mxu3 }
 0x25c   :  { %v322_v57 = vadd.f32 %v321_v22, %v202_v56 }
 0x25d   :  { %v298_v24 = vpop.f32.mrf.mxu1 }
 0x25e   :  { %v299_v25 = vadd.f32 %v298_v24, %v193_v23  ;;  %v955_v58 = vadd.f32 %v892_v59, %v322_v57 }
 0x260   :  { %v919_v26 = vadd.f32 %v892_v59, %v299_v25 }
 0x262   :  { %356 = vmax.xlane.f32.xlu2 %v919_v26 }
 0x263   :  { %v323_v28 = vpop.f32.mrf.mxu3 }
 0x264   :  { %v324_v30 = vadd.f32 %v323_v28, %v203_v27 }
 0x265   :  { %v301_v31 = vpop.f32.mrf.mxu1 }
 0x266   :  { %v302_v32 = vadd.f32 %v301_v31, %v194_v29  ;;  %v923_v33 = vadd.f32 %v892_v59, %v324_v30 }
 0x268   :  { %376 = vmax.xlane.f32.xlu0 %v923_v33  ;;  %v927_v34 = vadd.f32 %v892_v59, %v302_v32 }
 0x26a   :  { %358 = vmax.xlane.f32.xlu1 %v927_v34 }
 0x26d   :  { %v303_v36 = vpop.f32.mrf.mxu1 }
 0x26e   :  { %v304_v37 = vadd.f32 %v303_v36, %v195_v35 }
 0x270   :  { %v931_v38 = vadd.f32 %v892_v59, %v304_v37 }
 0x272   :  { %360 = vmax.xlane.f32.xlu2 %v931_v38 }
 0x275   :  { %v306_v40 = vpop.f32.mrf.mxu1 }
 0x276   :  { %v307_v41 = vadd.f32 %v306_v40, %v196_v39 }
 0x278   :  { %v935_v42 = vadd.f32 %v892_v59, %v307_v41 }
 0x27a   :  { %362 = vmax.xlane.f32.xlu1 %v935_v42 }
 0x27d   :  { %v308_v46 = vpop.f32.mrf.mxu1 }
 0x27e   :  { %v309_v47 = vadd.f32 %v308_v46, %v197_v44 }
 0x280   :  { %v939_v48 = vadd.f32 %v892_v59, %v309_v47 }
 0x282   :  { %364 = vmax.xlane.f32.xlu2 %v939_v48  ;;  %366 = vmax.xlane.f32.xlu1 %v942_v49 }
 0x28a   :  { %368 = vmax.xlane.f32.xlu2 %v947_v54  ;;  %372 = vmax.xlane.f32.xlu1 %v950_v55 }
 0x292   :  { %374 = vmax.xlane.f32.xlu2 %v955_v58 }
 0x2ad   :  { %v347_v60 = vpop.xlane.xlu1 %346 }
 0x2ae   :  { %v378_v61 = vsub.f32 %v895_v62, %v347_v60 }
 0x2b0   :  { %v394_v63 = vmul.f32 1.442695, %v378_v61 }
 0x2b2   :  { %680 = vpow2.f32 %v394_v63 }
 0x2b5   :  { %v349_v0 = vpop.xlane.xlu2 %348 }
 0x2b6   :  { %v379_v1 = vsub.f32 %v899_v3, %v349_v0 }
 0x2b8   :  { %v681_v2 = vpop.eup %680  ;;  %v396_v4 = vmul.f32 1.442695, %v379_v1 }
 0x2b9   :  { %426 = vadd.xlane.f32.xlu1 %v681_v2 }
 0x2ba   :  { %682 = vpow2.f32 %v396_v4 }
 0x2bd   :  { %v351_v5 = vpop.xlane.xlu0 %350 }
 0x2be   :  { %v380_v59 = vsub.f32 %v903_v8, %v351_v5 }
 0x2c0   :  { %v960_v6 = vpop.eup %682  ;;  %v398_v9 = vmul.f32 1.442695, %v380_v59 }
 0x2c1   :  { %v458_v7 = vpack.c.bf16 %v960_v6, %v681_v2 }
 0x2c2   :  { %684 = vpow2.f32 %v398_v9 }
 0x2c3   :  { %498 = vmatmul.bf16.vlgmr.msra.gmra.mxu2 %v458_v7 }
 0x2c5   :  { %v353_v10 = vpop.xlane.xlu2 %352  ;;  %v371_v62 = vpop.xlane.xlu0 %370 }
 0x2c6   :  { %v381_v11 = vsub.f32 %v910_v16, %v353_v10  ;;  %v390_v12 = vsub.f32 %v907_v15, %v371_v62 }
 0x2c8   :  { %v400_v3 = vmul.f32 1.442695, %v381_v11  ;;  %v418_v13 = vmul.f32 1.442695, %v390_v12  ;;  %v966_v17 = vpop.eup %684 }
 0x2ca   :  { %686 = vpow2.f32 %v400_v3 }
 0x2cb   :  { %688 = vpow2.f32 %v418_v13 }
 0x2cd   :  { %v355_v14 = vpop.xlane.xlu1 %354 }
 0x2ce   :  { %v382_v19 = vsub.f32 %v915_v21, %v355_v14 }
 0x2d0   :  { %v687_v18 = vpop.eup %686  ;;  %v402_v16 = vmul.f32 1.442695, %v382_v19 }
 0x2d1   :  { %v968_v8 = vpop.eup %688  ;;  %v459_v20 = vpack.c.bf16 %v687_v18, %v966_v17 }
 0x2d2   :  { %450 = vadd.xlane.f32.xlu1 %v968_v8  ;;  %690 = vpow2.f32 %v402_v16 }
 0x2d3   :  { %503 = vmatmul.bf16.gmra.mxu2 %v459_v20 }
 0x2d5   :  { %v357_v15 = vpop.xlane.xlu2 %356 }
 0x2d6   :  { %v383_v22 = vsub.f32 %v919_v26, %v357_v15 }
 0x2d8   :  { %v404_v23 = vmul.f32 1.442695, %v383_v22  ;;  %v691_v27 = vpop.eup %690 }
 0x2da   :  { %692 = vpow2.f32 %v404_v23  ;;  %432 = vadd.xlane.f32.xlu1 %v687_v18 }
 0x2db   :  { %v377_v43 = vpop.xlane.xlu0 %376 }
 0x2dc   :  { %v393_v47 = vsub.f32 %v923_v33, %v377_v43 }
 0x2dd   :  { %v359_v24 = vpop.xlane.xlu1 %358 }
 0x2de   :  { %v384_v25 = vsub.f32 %v927_v34, %v359_v24  ;;  %v424_v50 = vmul.f32 1.442695, %v393_v47 }
 0x2e0   :  { %v693_v28 = vpop.eup %692  ;;  %v406_v29 = vmul.f32 1.442695, %v384_v25 }
 0x2e1   :  { %v460_v21 = vpack.c.bf16 %v693_v28, %v691_v27 }
 0x2e2   :  { %694 = vpow2.f32 %v406_v29 }
 0x2e3   :  { %508 = vmatmul.bf16.gmra.mxu2 %v460_v21 }
 0x2e5   :  { %v361_v30 = vpop.xlane.xlu2 %360 }
 0x2e6   :  { %v385_v31 = vsub.f32 %v931_v38, %v361_v30 }
 0x2e8   :  { %v695_v32 = vpop.eup %694  ;;  %v408_v35 = vmul.f32 1.442695, %v385_v31 }
 0x2e9   :  { %438 = vadd.xlane.f32.xlu1 %v695_v32 }
 0x2ea   :  { %696 = vpow2.f32 %v408_v35 }
 0x2ed   :  { %v363_v26 = vpop.xlane.xlu1 %362 }
 0x2ee   :  { %v386_v37 = vsub.f32 %v935_v42, %v363_v26 }
 0x2f0   :  { %v697_v36 = vpop.eup %696  ;;  %v410_v34 = vmul.f32 1.442695, %v386_v37 }
 0x2f1   :  { %v461_v39 = vpack.c.bf16 %v697_v36, %v695_v32 }
 0x2f2   :  { %698 = vpow2.f32 %v410_v34 }
 0x2f3   :  { %513 = vmatmul.bf16.gmra.mxu2 %v461_v39 }
 0x2f5   :  { %v365_v40 = vpop.xlane.xlu2 %364  ;;  %v367_v41 = vpop.xlane.xlu1 %366 }
 0x2f6   :  { %v387_v44 = vsub.f32 %v939_v48, %v365_v40  ;;  %v388_v45 = vsub.f32 %v942_v49, %v367_v41 }
 0x2f8   :  { %v412_v46 = vmul.f32 1.442695, %v387_v44  ;;  %v414_v38 = vmul.f32 1.442695, %v388_v45  ;;  %v699_v52 = vpop.eup %698 }
 0x2fa   :  { %700 = vpow2.f32 %v412_v46 }
 0x2fb   :  { %702 = vpow2.f32 %v414_v38 }
 0x2fc   :  { %704 = vpow2.f32 %v424_v50 }
 0x2fd   :  { %v369_v51 = vpop.xlane.xlu2 %368 }
 0x2fe   :  { %v389_v42 = vsub.f32 %v947_v54, %v369_v51  ;;  %v373_v54 = vpop.xlane.xlu1 %372 }
 0x2ff   :  { %v391_v1 = vsub.f32 %v950_v55, %v373_v54 }
 0x300   :  { %v701_v53 = vpop.eup %700  ;;  %v416_v56 = vmul.f32 1.442695, %v389_v42 }
 0x301   :  { %v703_v57 = vpop.eup %702  ;;  %444 = vadd.xlane.f32.xlu1 %v701_v53  ;;  %v462_v48 = vpack.c.bf16 %v701_v53, %v699_v52 }
 0x302   :  { %706 = vpow2.f32 %v416_v56  ;;  %446 = vadd.xlane.f32.xlu2 %v703_v57  ;;  %v705_v60 = vpop.eup %704 }
 0x303   :  { %518 = vmatmul.bf16.gmra.mxu2 %v462_v48 }
 0x305   :  { %v375_v49 = vpop.xlane.xlu2 %374 }
 0x306   :  { %v392_v33 = vsub.f32 %v955_v58, %v375_v49  ;;  %v420_v58 = vmul.f32 1.442695, %v391_v1 }
 0x308   :  { %v707_v61 = vpop.eup %706  ;;  %v422_v63 = vmul.f32 1.442695, %v392_v33 }
 0x309   :  { %448 = vadd.xlane.f32.xlu0 %v707_v61  ;;  %456 = vadd.xlane.f32.xlu1 %v705_v60  ;;  %v463_v2 = vpack.c.bf16 %v707_v61, %v703_v57 }
 0x30a   :  { %708 = vpow2.f32 %v422_v63  ;;  %428 = vadd.xlane.f32.xlu2 %v960_v6 }
 0x30b   :  { %710 = vpow2.f32 %v420_v58 }
 0x310   :  { %v709_v0 = vpop.eup %708 }
 0x311   :  { %430 = vadd.xlane.f32.xlu0 %v966_v17  ;;  %v465_v4 = vpack.c.bf16 %v705_v60, %v709_v0  ;;  %v711_v5 = vpop.eup %710 }
 0x312   :  { %434 = vadd.xlane.f32.xlu2 %v691_v27  ;;  %v464_v59 = vpack.c.bf16 %v711_v5, %v968_v8 }
 0x313   :  { %523 = vmatmul.bf16.gmra.mxu2 %v463_v2  ;;  %533 = vmatmul.bf16.vlgmr.msrb.gmra.mxu3 %v465_v4 }
 0x319   :  { %436 = vadd.xlane.f32.xlu0 %v693_v28 }
 0x31a   :  { %440 = vadd.xlane.f32.xlu2 %v697_v36 }
 0x321   :  { %442 = vadd.xlane.f32.xlu0 %v699_v52 }
 0x322   :  { %452 = vadd.xlane.f32.xlu2 %v711_v5 }
 0x323   :  { %528 = vmatmul.bf16.gmra.mxu2 %v464_v59 }
 0x329   :  { %454 = vadd.xlane.f32.xlu0 %v709_v0 }
 0x32c   :  { %v427_v6 = vpop.xlane.xlu1 %426 }
 0x32d   :  { %712 = vrcp.f32 %v427_v6 }
 0x333   :  { %v713_v55 = vpop.eup %712 }
 0x345   :  { %v990_v10 = vpop.xlane.xlu1 %450 }
 0x346   :  { %v499_v7 = vpop.f32.mrf.mxu2 }
 0x347   :  { %v555_v9 = vmul.f32 %v713_v55, %v499_v7 }
 0x349   :  { %571 = vst.msk [vmem:[%s1057_s4] sm:$0xff] %vm228_vm1, %v555_v9 }
 0x34d   :  { %v433_v11 = vpop.xlane.xlu1 %432 }
 0x34e   :  { %v501_v62 = vpop.f32.mrf.mxu2  ;;  %714 = vrcp.f32 %v433_v11 }
 0x354   :  { %v715_v3 = vpop.eup %714 }
 0x356   :  { %v504_v12 = vpop.f32.mrf.mxu2 }
 0x35c   :  { %v439_v18 = vpop.xlane.xlu1 %438 }
 0x35d   :  { %716 = vrcp.f32 %v439_v18 }
 0x35e   :  { %v506_v13 = vpop.f32.mrf.mxu2 }
 0x35f   :  { %v558_v14 = vmul.f32 %v715_v3, %v506_v13 }
 0x361   :  { %574 = vst.msk [vmem:[%s1057_s4 + $0x18] sm:$0xff] %vm228_vm1, %v558_v14 }
 0x363   :  { %v717_v20 = vpop.eup %716 }
 0x366   :  { %v509_v17 = vpop.f32.mrf.mxu2 }
 0x36e   :  { %v511_v8 = vpop.f32.mrf.mxu2 }
 0x374   :  { %v445_v28 = vpop.xlane.xlu1 %444 }
 0x375   :  { %v447_v19 = vpop.xlane.xlu2 %446 }
 0x376   :  { %v514_v16 = vpop.f32.mrf.mxu2 }
 0x377   :  { %v561_v15 = vmul.f32 %v717_v20, %v514_v16 }
 0x379   :  { %577 = vst.msk [vmem:[%s1057_s4 + $0x30] sm:$0xff] %vm228_vm1, %v561_v15 }
 0x37c   :  { %v449_v22 = vpop.xlane.xlu0 %448  ;;  %v457_v44 = vpop.xlane.xlu1 %456 }
 0x37d   :  { %v429_v23 = vpop.xlane.xlu2 %428 }
 0x37e   :  { %718 = vrcp.f32 %v429_v23  ;;  %v516_v24 = vpop.f32.mrf.mxu2 }
 0x384   :  { %v719_v25 = vpop.eup %718  ;;  %v431_v27 = vpop.xlane.xlu0 %430 }
 0x385   :  { %v556_v29 = vmul.f32 %v719_v25, %v501_v62  ;;  %v435_v21 = vpop.xlane.xlu2 %434  ;;  %720 = vrcp.f32 %v431_v27 }
 0x386   :  { %722 = vrcp.f32 %v435_v21  ;;  %v519_v30 = vpop.f32.mrf.mxu2 }
 0x387   :  { %572 = vst.msk [vmem:[%s1057_s4 + $0x8] sm:$0xff] %vm228_vm1, %v556_v29  ;;  %724 = vrcp.f32 %v445_v28 }
 0x38b   :  { %v721_v31 = vpop.eup %720 }
 0x38c   :  { %v723_v32 = vpop.eup %722  ;;  %v557_v35 = vmul.f32 %v721_v31, %v504_v12  ;;  %v437_v26 = vpop.xlane.xlu0 %436 }
 0x38d   :  { %v559_v36 = vmul.f32 %v723_v32, %v509_v17  ;;  %v441_v37 = vpop.xlane.xlu2 %440  ;;  %726 = vrcp.f32 %v437_v26  ;;  %v725_v39 = vpop.eup %724 }
 0x38e   :  { %573 = vst.msk [vmem:[%s1057_s4 + $0x10] sm:$0xff] %vm228_vm1, %v557_v35  ;;  %728 = vrcp.f32 %v441_v37  ;;  %v521_v34 = vpop.f32.mrf.mxu2 }
 0x38f   :  { %575 = vst.msk [vmem:[%s1057_s4 + $0x20] sm:$0xff] %vm228_vm1, %v559_v36  ;;  %v564_v40 = vmul.f32 %v725_v39, %v521_v34  ;;  %730 = vrcp.f32 %v447_v19 }
 0x391   :  { %580 = vst.msk [vmem:[%s1057_s4 + $0x48] sm:$0xff] %vm228_vm1, %v564_v40 }
 0x393   :  { %v727_v41 = vpop.eup %726 }
 0x394   :  { %v729_v43 = vpop.eup %728  ;;  %v560_v45 = vmul.f32 %v727_v41, %v511_v8  ;;  %v443_v46 = vpop.xlane.xlu0 %442 }
 0x395   :  { %v562_v38 = vmul.f32 %v729_v43, %v516_v24  ;;  %732 = vrcp.f32 %v443_v46  ;;  %v731_v47 = vpop.eup %730  ;;  %v453_v0 = vpop.xlane.xlu2 %452 }
 0x396   :  { %576 = vst.msk [vmem:[%s1057_s4 + $0x28] sm:$0xff] %vm228_vm1, %v560_v45  ;;  %v524_v50 = vpop.f32.mrf.mxu2  ;;  %v534_v51 = vpop.f32.mrf.mxu3  ;;  %734 = vrcp.f32 %v457_v44 }
 0x397   :  { %578 = vst.msk [vmem:[%s1057_s4 + $0x38] sm:$0xff] %vm228_vm1, %v562_v38  ;;  %v565_v42 = vmul.f32 %v731_v47, %v524_v50  ;;  %736 = vrcp.f32 %v449_v22 }
 0x399   :  { %581 = vst.msk [vmem:[%s1057_s4 + $0x50] sm:$0xff] %vm228_vm1, %v565_v42 }
 0x39b   :  { %v733_v52 = vpop.eup %732 }
 0x39c   :  { %v563_v53 = vmul.f32 %v733_v52, %v519_v30  ;;  %v455_v56 = vpop.xlane.xlu0 %454  ;;  %v735_v57 = vpop.eup %734 }
 0x39d   :  { %738 = vrcp.f32 %v455_v56  ;;  %v737_v48 = vpop.eup %736 }
 0x39e   :  { %579 = vst.msk [vmem:[%s1057_s4 + $0x40] sm:$0xff] %vm228_vm1, %v563_v53  ;;  %v526_v49 = vpop.f32.mrf.mxu2  ;;  %v536_v33 = vpop.f32.mrf.mxu3  ;;  %740 = vrcp.f32 %v990_v10 }
 0x39f   :  { %v566_v60 = vmul.f32 %v737_v48, %v526_v49  ;;  %v570_v61 = vmul.f32 %v735_v57, %v536_v33  ;;  %742 = vrcp.f32 %v453_v0 }
 0x3a1   :  { %582 = vst.msk [vmem:[%s1057_s4 + $0x58] sm:$0xff] %vm228_vm1, %v566_v60 }
 0x3a2   :  { %586 = vst.msk [vmem:[%s1057_s4 + $0x78] sm:$0xff] %vm228_vm1, %v570_v61 }
 0x3a3   :  { %v739_v63 = vpop.eup %738 }
 0x3a4   :  { %v569_v54 = vmul.f32 %v739_v63, %v534_v51  ;;  %v741_v1 = vpop.eup %740 }
 0x3a5   :  { %v743_v58 = vpop.eup %742 }
 0x3a6   :  { %585 = vst.msk [vmem:[%s1057_s4 + $0x70] sm:$0xff] %vm228_vm1, %v569_v54  ;;  %v529_v2 = vpop.f32.mrf.mxu2 }
 0x3a7   :  { %v567_v4 = vmul.f32 %v741_v1, %v529_v2 }
 0x3a9   :  { %583 = vst.msk [vmem:[%s1057_s4 + $0x60] sm:$0xff] %vm228_vm1, %v567_v4 }
 0x3ae   :  { %v531_v5 = vpop.f32.mrf.mxu2 }
 0x3af   :  { %v568_v59 = vmul.f32 %v743_v58, %v531_v5 }
 0x3b1   :  { %584 = vst.msk [vmem:[%s1057_s4 + $0x68] sm:$0xff] %vm228_vm1, %v568_v59 }
 0x3b2   :  { %591 = vsyncpa [#allocation3], 1 }

</bundles_post_ra>
